<compile_context>
chip_gen: v6e
topology: v6e:2x2x1
jax: 0.10.0
libtpu: 0.0.40
codegen_flags: <defaults>
</compile_context>

<pallas_src>
import jax
import jax.numpy as jnp
from jax.experimental import pallas as pl
from jax.experimental.pallas import tpu as pltpu

LANE = 128      # TPU lane width (last dim)
SUBLANE = 8     # f32 sublane width (second-to-last dim)


def _round_up(x, m):
    return ((x + m - 1) // m) * m


def _fused_linear_relu_kernel(x_ref, w_ref, b_ref, o_ref):
    # y = relu(x @ W + b); W is the folded (w1 @ w2) weight, lane-padded to 128.
    y = jnp.dot(x_ref[...], w_ref[...], preferred_element_type=jnp.float32)
    o_ref[...] = jnp.maximum(y + b_ref[...], 0.0).astype(o_ref.dtype)


def network_forward(s, w1, b1, w2, b2, *, tile_b=512):
    """relu(linear2(linear1(s))) via a single fused Pallas matmul kernel.

    Weights are stored as (in_features, out_features) so y = x @ W + b
    (equivalent to PyTorch nn.Linear, which stores (out, in) and does x @ W.T).
    """
    batch, n_features = s.shape
    n_actions = w2.shape[1]

    # Fold the two linear layers (valid: no activation between them).
    w = jnp.dot(w1.astype(jnp.float32), w2.astype(jnp.float32),
                preferred_element_type=jnp.float32)                      # (F, A)
    b = (jnp.dot(b1.astype(jnp.float32), w2.astype(jnp.float32),
                 preferred_element_type=jnp.float32)
         + b2.astype(jnp.float32)).reshape(1, n_actions)                 # (1, A)

    # Lane-dense output: pad A up to a multiple of 128.
    a_pad = _round_up(n_actions, LANE)
    w_p = jnp.pad(w, ((0, 0), (0, a_pad - n_actions)))
    b_p = jnp.pad(b, ((0, 0), (0, a_pad - n_actions)))

    # Batch tiling: tile must be a multiple of the f32 sublane width (8).
    tb = min(_round_up(tile_b, SUBLANE), _round_up(batch, SUBLANE))
    b_pad = _round_up(batch, tb)
    s_p = s.astype(jnp.float32)
    if b_pad != batch:
        s_p = jnp.pad(s_p, ((0, b_pad - batch), (0, 0)))

    out = pl.pallas_call(
        _fused_linear_relu_kernel,
        out_shape=jax.ShapeDtypeStruct((b_pad, a_pad), jnp.float32),
        grid=(b_pad // tb,),
        in_specs=[
            pl.BlockSpec((tb, n_features), lambda i: (i, 0)),     # activations: batch-tiled
            pl.BlockSpec((n_features, a_pad), lambda i: (0, 0)),  # folded weight: VMEM-resident
            pl.BlockSpec((1, a_pad), lambda i: (0, 0)),           # folded bias: VMEM-resident
        ],
        out_specs=pl.BlockSpec((tb, a_pad), lambda i: (i, 0)),
        compiler_params=pltpu.CompilerParams(
            dimension_semantics=("parallel",),  # shard batch tiles across TCs on v7x
        ),
    )(s_p, w_p, b_p)

    return out[:batch, :n_actions]


if __name__ == "__main__":
    key = jax.random.PRNGKey(0)
    batch, n_features, n_neuron, n_actions = 8, 32, 10, 4

    k_in, k1, k2, k3, k4 = jax.random.split(key, 5)
    s = jax.random.normal(k_in, (batch, n_features), jnp.float32)
    # PyTorch nn.Linear stores weight as (out, in); we keep (in, out) for x @ W.
    w1 = jax.random.normal(k1, (n_features, n_neuron), jnp.float32) * 0.1
    b1 = jax.random.normal(k2, (1, n_neuron), jnp.float32) * 0.1
    w2 = jax.random.normal(k3, (n_neuron, n_actions), jnp.float32) * 0.1
    b2 = jax.random.normal(k4, (1, n_actions), jnp.float32) * 0.1

    q = network_forward(s, w1, b1, w2, b2)
    jax.block_until_ready(q)

    # Pure-JAX reference: Sequential(Linear, Linear, ReLU) — no hidden activation.
    ref = jnp.maximum((s @ w1 + b1) @ w2 + b2, 0.0)
    assert q.shape == (batch, n_actions)
    assert jnp.allclose(q, ref, atol=1e-5, rtol=1e-5), float(jnp.max(jnp.abs(q - ref)))

    # Ragged-batch path (exercises batch padding).
    s2 = s[:6]
    q2 = network_forward(s2, w1, b1, w2, b2)
    jax.block_until_ready(q2)
    ref2 = jnp.maximum((s2 @ w1 + b1) @ w2 + b2, 0.0)
    assert q2.shape == (6, n_actions)
    assert jnp.allclose(q2, ref2, atol=1e-5, rtol=1e-5), float(jnp.max(jnp.abs(q2 - ref2)))

    print("KERNEL_OK")
</pallas_src>

<mosaic_0001>
module attributes {stable_mosaic.version = 11 : i64} {
  func.func @_fused_linear_relu_kernel(%arg0: i32, %arg1: memref<8x32xf32, #tpu.memory_space<vmem>>, %arg2: memref<32x128xf32, #tpu.memory_space<vmem>>, %arg3: memref<1x128xf32, #tpu.memory_space<vmem>>, %arg4: memref<8x128xf32, #tpu.memory_space<vmem>>) attributes {dimension_semantics = [#tpu.dimension_semantics<parallel>], iteration_bounds = array<i64: 1>, scalar_prefetch = 0 : i64, scratch_operands = 0 : i64, tpu.core_type = #tpu.core_type<tc>, window_params = [{transform_indices = @transform_0, window_bounds = array<i64: 8, 32>}, {pipeline_mode = #tpu.pipeline_mode<synchronous>, transform_indices = @transform_1, window_bounds = array<i64: 32, 128>}, {pipeline_mode = #tpu.pipeline_mode<synchronous>, transform_indices = @transform_2, window_bounds = array<i64: 1, 128>}, {transform_indices = @transform_3, window_bounds = array<i64: 8, 128>}]} {
    %c0 = arith.constant 0 : index
    %c0_0 = arith.constant 0 : index
    %0 = vector.load %arg1[%c0, %c0_0] : memref<8x32xf32, #tpu.memory_space<vmem>>, vector<8x32xf32>
    %c0_1 = arith.constant 0 : index
    %c0_2 = arith.constant 0 : index
    %1 = vector.load %arg2[%c0_1, %c0_2] : memref<32x128xf32, #tpu.memory_space<vmem>>, vector<32x128xf32>
    %cst = arith.constant dense<0.000000e+00> : vector<8x128xf32>
    %2 = tpu.matmul %0, %1, %cst {dimension_numbers = #tpu.dot_dimension_numbers<[1], [0], [0], [1], [0, 0, 1, 1], [], []>} : vector<8x32xf32>, vector<32x128xf32>, vector<8x128xf32> -> vector<8x128xf32>
    %c0_3 = arith.constant 0 : index
    %c0_4 = arith.constant 0 : index
    %3 = vector.load %arg3[%c0_3, %c0_4] : memref<1x128xf32, #tpu.memory_space<vmem>>, vector<1x128xf32>
    %4 = vector.broadcast %3 : vector<1x128xf32> to vector<8x128xf32>
    %5 = arith.addf %2, %4 : vector<8x128xf32>
    %cst_5 = arith.constant 0.000000e+00 : f32
    %6 = vector.broadcast %cst_5 : f32 to vector<8x128xf32>
    %7 = arith.maximumf %5, %6 : vector<8x128xf32>
    %c0_6 = arith.constant 0 : index
    %c0_7 = arith.constant 0 : index
    %8 = vector.load %arg4[%c0_6, %c0_7] : memref<8x128xf32, #tpu.memory_space<vmem>>, vector<8x128xf32>
    tpu.vector_store %arg4[%c0_6, %c0_7], %7 {strides = array<i32>} : memref<8x128xf32, #tpu.memory_space<vmem>>, vector<8x128xf32>,
    return
  }
  func.func @transform_0(%arg0: i32) -> (i32, i32) {
    %c0_i32 = arith.constant 0 : i32
    %c0_i32_0 = arith.constant 0 : i32
    return %arg0, %c0_i32 : i32, i32
  }
  func.func @transform_1(%arg0: i32) -> (i32, i32) {
    %c0_i32 = arith.constant 0 : i32
    %c0_i32_0 = arith.constant 0 : i32
    %c0_i32_1 = arith.constant 0 : i32
    return %c0_i32, %c0_i32_0 : i32, i32
  }
  func.func @transform_2(%arg0: i32) -> (i32, i32) {
    %c0_i32 = arith.constant 0 : i32
    %c0_i32_0 = arith.constant 0 : i32
    %c0_i32_1 = arith.constant 0 : i32
    return %c0_i32, %c0_i32_0 : i32, i32
  }
  func.func @transform_3(%arg0: i32) -> (i32, i32) {
    %c0_i32 = arith.constant 0 : i32
    %c0_i32_0 = arith.constant 0 : i32
    return %arg0, %c0_i32 : i32, i32
  }
}

</mosaic_0001>

<bundles_post_ra>
// kernel: tpu_custom_call.1
= control target key start
LH: loop header
LB: loop body
LE: loop exit
PB: predicated region body
PF: predicated region fallthrough
CT: control target
= control target key end

     0   :  { %8 = vsyncpa [#allocation3], 0  ;;  %s275_s0 = inlined_call_operand.hbm [shape: f32[8,32], index: 0, kind: input, shape index: {}]   ;;  %s276_s1 = inlined_call_operand.hbm [shape: f32[32,128], index: 1, kind: input, shape index: {}]   ;;  %s277_s2 = inlined_call_operand.vmem [shape: f32[1,128], index: 2, kind: input, shape index: {}]   ;;  %s278_s3 = inlined_call_operand.hbm [shape: f32[8,128], index: 3, kind: output, shape index: {}]  }
   0x1   :  { %9 = vsyncpa [#allocation6], 0 }
   0x2   :  { %10 = vsyncpa [#allocation4], 0  ;;  %s236_s12 = smov [#allocation2]   ;;  %s237_s14 = smov [#allocation5]  }
   0x3   :  { %s17_s13 = sshll.u32 %s236_s12, 4  ;;  %s26_s15 = sshll.u32 %s237_s14, 4  ;;  %s18_s13 = int_to_ptr.vmem [resolvable:$true] %s17_s13  ;;  %s27_s15 = int_to_ptr.vmem [resolvable:$true] %s26_s15 }
   0x4   :  { %s178_s16 = scalar_lea.vmem %s18_s13, 128  ;;  %p183_p1 = scmp.lt.s32.totalorder %s18_s13, %s18_s13 }
   0x5   :  { %p179_p0 = scmp.ne.s32.totalorder %s18_s13, %s178_s16  ;;  %p184_p2 = scmp.lt.s32.totalorder %s178_s16, %s178_s16 }
   0x7   :  { %p185_p3 = por %p184_p2, %p183_p1 }
   0x9   :  { %p186_p4 = pnand %p185_p3, %p179_p0 }
   0xb   :  { %189 = shalt.err (!%p186_p4)
}
   0xc   :  { %20 = dma.hbm_to_vmem [thread:$0]  %s275_s0, 128, %s18_s13, [#allocation3]  }
   0xd   :  { %s198_s19 = scalar_lea.vmem %s27_s15, 512  ;;  %p203_p6 = scmp.lt.s32.totalorder %s27_s15, %s27_s15 }
   0xe   :  { %p199_p5 = scmp.ne.s32.totalorder %s27_s15, %s198_s19  ;;  %p204_p7 = scmp.lt.s32.totalorder %s198_s19, %s198_s19 }
  0x10   :  { %p205_p8 = por %p204_p7, %p203_p6 }
  0x12   :  { %p206_p9 = pnand %p205_p8, %p199_p5 }
  0x14   :  { %209 = shalt.err (!%p206_p9)
}
  0x15   :  { %s238_s20 = smov 128   ;;  %s239_s21 = smov 8  }
  0x16   :  { %32 = dma.hbm_to_vmem [thread:$0]  %s276_s1, 512, %s27_s15, [#allocation6], %s238_s20, %s238_s20, %s239_s21  }
  0x17   :  { %230 = dma.done.wait [#allocation3], 128  }
  0x18   :  { %231 = vsyncadd [#allocation3], 4294967168 }
  0x19   :  { %232 = dma.done.wait [#allocation6], 512  }
  0x1a   :  { %233 = vsyncadd [#allocation6], 4294966784  ;;  %v240_v0 = vmov 0.0   ;;  %vm241_vm0 = vmmov 0   ;;  %v45_v1 = vld [vmem:[#allocation5 + $0x18] sm:$0xff]  ;;  %v44_v2 = vld [vmem:[#allocation5 + $0x10] sm:$0xff] }
  0x1b   :  { %152 = vmatprep.subr.mxu0 %v240_v0  ;;  %160 = vmatprep.mubr.msk.f32.mxu0 %vm241_vm0, %v240_v0  ;;  %v43_v3 = vld [vmem:[#allocation5 + $0x8] sm:$0xff]  ;;  %v42_v4 = vld [vmem:[#allocation5] sm:$0xff]  ;;  %v41_v5 = vld [vmem:[#allocation2] sm:$0xff]  ;;  %vm53_vm1 = vcmask 261120   ;;  %s242_s24 = smov [#allocation7]  }
  0x1c   :  { %153 = vmatpush3.msra.mxu0 %v45_v1  ;;  %v145_v6 = vld [vmem:[%s277_s2] ss:$0 sm:$0xff]  ;;  %s135_s25 = sshll.u32 %s242_s24, 4  ;;  %s136_s25 = int_to_ptr.vmem [resolvable:$true] %s135_s25 }
  0x1d   :  { %154 = vmatprep.subr.mxu0 %v240_v0  ;;  %s210_s26 = scalar_lea.vmem %s136_s25, 128  ;;  %p215_p11 = scmp.lt.s32.totalorder %s136_s25, %s136_s25 }
  0x1e   :  { %155 = vmatpush3.msra.mxu0 %v44_v2  ;;  %p211_p10 = scmp.ne.s32.totalorder %s136_s25, %s210_s26  ;;  %p216_p12 = scmp.lt.s32.totalorder %s210_s26, %s210_s26 }
  0x1f   :  { %156 = vmatprep.subr.mxu0 %v240_v0 }
  0x20   :  { %157 = vmatpush3.msra.mxu0 %v43_v3  ;;  %p217_p13 = por %p216_p12, %p215_p11 }
  0x21   :  { %158 = vmatprep.subr.mxu0 %v240_v0 }
  0x22   :  { %159 = vmatpush3.msra.mxu0 %v42_v4  ;;  %p218_p0 = pnand %p217_p13, %p211_p10 }
  0x23   :  { %161 = vmatmul.mubr.msk.f32.vlgmr.msra.gmra.mxu0 %vm53_vm1, %v41_v5 }
  0xe3   :  { %v123_v7 = vpop.f32.mrf.mxu0 }
  0xe4   :  { %v124_v8 = vadd.f32 %v145_v6, %v123_v7 }
  0xe5   :  { %v162_v9 = vpop.f32.mrf.mxu0 }
  0xe6   :  { %v127_v10 = vmax.f32 %v124_v8, 0.0 }
  0xe8   :  { %128 = vst [vmem:[#allocation7] sm:$0xff] %v127_v10 }
  0xe9   :  { %221 = shalt.err (!%p218_p0)
}
  0xea   :  { %138 = dma.vmem_to_hbm [thread:$0]  %s136_s25, 128, %s278_s3, [#allocation4]  }
  0xeb   :  { %234 = dma.done.wait [#allocation4], 128  }
  0xec   :  { %235 = vsyncadd [#allocation4], 4294967168 }
  0xed   :  { %142 = vsyncpa [#allocation3], 1 }
  0xee   :  { %143 = vsyncpa [#allocation6], 1 }
  0xef   :  { %144 = vsyncpa [#allocation4], 1 }

</bundles_post_ra>
